<compile_context>
chip_gen: v7x
topology: tpu7x:2x2x1
jax: 0.10.0
libtpu: 0.0.40
codegen_flags: <defaults>
</compile_context>

<pallas_src>
import functools

import jax
import jax.numpy as jnp
from jax.experimental import pallas as pl
from jax.experimental.pallas import tpu as pltpu

_LANE = 128
_VMEM_LIMIT = 32 * 1024 * 1024          # scoped VMEM limit requested (all gens)


def _round_up(x, m):
    return (x + m - 1) // m * m


def _sublane(dtype):
    # Sublane packing granularity: 8 for 32-bit, 16 for 16-bit, 32 for 8-bit.
    return max(8, 32 // jnp.dtype(dtype).itemsize)


# ---------------------------------------------------------------------------
# Fused single-pass kernel: one grid step == one batch sample.
#   x_ref, o_ref: [C, HW] (native dtype)     w1_ref, w2_ref: [C, C] f32
# ---------------------------------------------------------------------------
def _ca_fused_kernel(x_ref, w1_ref, w2_ref, o_ref, *, inv_hw):
    x = x_ref[...]                                                  # [C, HW]
    # Global average pool: f32 lane-reduction, divide by the true H*W.
    m = jnp.sum(x.astype(jnp.float32), axis=1, keepdims=True) * inv_hw   # [C, 1]
    # conv1x1 -> ReLU -> conv1x1 -> sigmoid (bias-free), f32 mat-vecs.
    z1 = jnp.maximum(
        jnp.dot(w1_ref[...], m, preferred_element_type=jnp.float32), 0.0)
    gate = jax.nn.sigmoid(
        jnp.dot(w2_ref[...], z1, preferred_element_type=jnp.float32))
    # Channel gating, broadcast across the spatial (lane) axis; native dtype.
    o_ref[...] = x * gate.astype(x.dtype)


# ---------------------------------------------------------------------------
# Two-pass fallback for feature maps whose [C, HW] slab does not fit VMEM.
# Pass A: spatially tiled sum-reduce, gate finalize at the last spatial tile.
#   gate_ref doubles as the f32 running-sum accumulator (resident across j).
# ---------------------------------------------------------------------------
def _ca_gate_kernel(x_ref, w1_ref, w2_ref, gate_ref, *, inv_hw, hw, t_hw, masked):
    j = pl.program_id(1)

    @pl.when(j == 0)
    def _():
        gate_ref[...] = jnp.zeros_like(gate_ref)

    x = x_ref[...].astype(jnp.float32)                              # [C, t_hw]
    if masked:  # ragged last spatial tile: exclude out-of-range lanes
        lane = jax.lax.broadcasted_iota(jnp.int32, x.shape, 1) + j * t_hw
        x = jnp.where(lane < hw, x, 0.0)
    gate_ref[...] += jnp.sum(x, axis=1, keepdims=True)              # [C, 1]

    @pl.when(j == pl.num_programs(1) - 1)
    def _():
        m = gate_ref[...] * inv_hw
        z1 = jnp.maximum(
            jnp.dot(w1_ref[...], m, preferred_element_type=jnp.float32), 0.0)
        gate_ref[...] = jax.nn.sigmoid(
            jnp.dot(w2_ref[...], z1, preferred_element_type=jnp.float32))


# Pass B: spatially tiled gating multiply.
def _ca_apply_kernel(x_ref, gate_ref, o_ref):
    x = x_ref[...]                                                  # [C, t_hw]
    o_ref[...] = x * gate_ref[...].astype(x.dtype)                  # gate [C, 1]


# ---------------------------------------------------------------------------
# Wrapper / dispatch
# ---------------------------------------------------------------------------
def ca_layer(x_nchw, w1, w2, *, max_vmem_bytes=20 * 1024 * 1024):
    """CALayer forward: x * sigmoid(W2 @ relu(W1 @ mean_hw(x))).

    x_nchw: [N, C, H, W], any float dtype (HBM I/O stays native).
    w1, w2: [C, C] weights of the two bias-free 1x1 convs
            (i.e. PyTorch conv weight[:, :, 0, 0]).
    """
    N, C, H, W = x_nchw.shape
    hw = H * W
    dt = x_nchw.dtype
    isz = jnp.dtype(dt).itemsize
    x3 = x_nchw.reshape(N, C, hw)                 # contiguous collapse: no copy
    w1f = jnp.asarray(w1, jnp.float32)
    w2f = jnp.asarray(w2, jnp.float32)
    inv_hw = 1.0 / float(hw)

    cpad = _round_up(C, _sublane(dt))
    slab = cpad * _round_up(hw, _LANE) * isz                 # one x/out block
    w_bytes = 2 * 2 * _round_up(C, 8) * _round_up(C, _LANE) * 4
    fused_live = 4 * slab + w_bytes                          # 2x double-buffered

    cparams = lambda sem: pltpu.CompilerParams(              # noqa: E731
        dimension_semantics=sem, vmem_limit_bytes=_VMEM_LIMIT)

    if fused_live <= max_vmem_bytes:
        # ------ fused single pass: x read from HBM once, written once -------
        out3 = pl.pallas_call(
            functools.partial(_ca_fused_kernel, inv_hw=inv_hw),
            out_shape=jax.ShapeDtypeStruct((N, C, hw), dt),
            grid=(N,),
            in_specs=[
                pl.BlockSpec((None, C, hw), lambda n: (n, 0, 0)),
                pl.BlockSpec((C, C), lambda n: (0, 0)),
                pl.BlockSpec((C, C), lambda n: (0, 0)),
            ],
            out_specs=pl.BlockSpec((None, C, hw), lambda n: (n, 0, 0)),
            compiler_params=cparams(("parallel",)),
        )(x3, w1f, w2f)
        return out3.reshape(N, C, H, W)

    # ------ two-pass fallback: tiled sum-reduce + gate, then tiled apply ----
    tile_bytes = max(cpad * _LANE * isz, min(2 * 1024 * 1024, max_vmem_bytes // 8))
    t_hw = max(_LANE, (tile_bytes // (cpad * isz)) // _LANE * _LANE)
    t_hw = min(t_hw, _round_up(hw, _LANE))
    n_sp = -(-hw // t_hw)
    masked = (hw % t_hw) != 0

    gate = pl.pallas_call(
        functools.partial(_ca_gate_kernel, inv_hw=inv_hw, hw=hw,
                          t_hw=t_hw, masked=masked),
        out_shape=jax.ShapeDtypeStruct((N, C, 1), jnp.float32),
        grid=(N, n_sp),
        in_specs=[
            pl.BlockSpec((None, C, t_hw), lambda n, j: (n, 0, j)),
            pl.BlockSpec((C, C), lambda n, j: (0, 0)),
            pl.BlockSpec((C, C), lambda n, j: (0, 0)),
        ],
        out_specs=pl.BlockSpec((None, C, 1), lambda n, j: (n, 0, 0)),
        compiler_params=cparams(("parallel", "arbitrary")),
    )(x3, w1f, w2f)

    out3 = pl.pallas_call(
        _ca_apply_kernel,
        out_shape=jax.ShapeDtypeStruct((N, C, hw), dt),
        grid=(N, n_sp),
        in_specs=[
            pl.BlockSpec((None, C, t_hw), lambda n, j: (n, 0, j)),
            pl.BlockSpec((None, C, 1), lambda n, j: (n, 0, 0)),
        ],
        out_specs=pl.BlockSpec((None, C, t_hw), lambda n, j: (n, 0, j)),
        compiler_params=cparams(("parallel", "parallel")),
    )(x3, gate)
    return out3.reshape(N, C, H, W)


# ---------------------------------------------------------------------------
# Pure-JAX reference (mirrors the PyTorch module) for correctness checks.
# ---------------------------------------------------------------------------
def ca_layer_ref(x, w1, w2):
    xf = x.astype(jnp.float32)
    m = jnp.mean(xf, axis=(2, 3), keepdims=True)                  # [N, C, 1, 1]
    z1 = jnp.maximum(jnp.einsum('oc,nchw->nohw', w1, m), 0.0)
    gate = jax.nn.sigmoid(jnp.einsum('oc,nchw->nohw', w2, z1))
    return xf * gate


if __name__ == "__main__":
    key = jax.random.PRNGKey(0)
    kx, k1, k2 = jax.random.split(key, 3)

    N, C, H, W = 2, 4, 16, 16
    x = jax.random.normal(kx, (N, C, H, W), jnp.float32)          # NCHW like PyTorch
    w1 = jax.random.normal(k1, (C, C), jnp.float32) * 0.3         # Conv2d(C,C,1) weights
    w2 = jax.random.normal(k2, (C, C), jnp.float32) * 0.3
    ref = ca_layer_ref(x, w1, w2)

    # 1) fused single-pass path, f32 I/O.
    out = jax.jit(ca_layer)(x, w1, w2)
    jax.block_until_ready(out)
    assert out.shape == (N, C, H, W) and out.dtype == x.dtype
    assert bool(jnp.all(jnp.isfinite(out)))
    assert bool(jnp.allclose(out, ref, atol=1e-5, rtol=1e-5))

    # 2) fused path with native bf16 HBM I/O (compute stays f32 inside).
    xb = x.astype(jnp.bfloat16)
    outb = jax.jit(ca_layer)(xb, w1, w2)
    jax.block_until_ready(outb)
    assert outb.dtype == jnp.bfloat16
    assert bool(jnp.allclose(outb.astype(jnp.float32), ref, atol=5e-2, rtol=5e-2))

    # 3) two-pass large-H*W fallback (forced via a tiny fused-VMEM budget).
    two_pass = jax.jit(functools.partial(ca_layer, max_vmem_bytes=16 * 1024))
    out2 = two_pass(x, w1, w2)
    jax.block_until_ready(out2)
    assert bool(jnp.allclose(out2, ref, atol=1e-5, rtol=1e-5))

    # 4) fused path with a non-128-multiple spatial size (masked lane tail,
    #    no wrapper-side pad/slice).
    x15 = jax.random.normal(kx, (N, C, 15, 15), jnp.float32)
    out15 = jax.jit(ca_layer)(x15, w1, w2)
    jax.block_until_ready(out15)
    assert bool(jnp.allclose(out15, ca_layer_ref(x15, w1, w2), atol=1e-5, rtol=1e-5))

    print("KERNEL_OK")
</pallas_src>

<mosaic_0001>
module attributes {stable_mosaic.version = 11 : i64} {
  func.func @_ca_fused_kernel(%arg0: i32, %arg1: memref<1x4x256xf32, #tpu.memory_space<vmem>>, %arg2: memref<4x4xf32, #tpu.memory_space<vmem>>, %arg3: memref<4x4xf32, #tpu.memory_space<vmem>>, %arg4: memref<1x4x256xf32, #tpu.memory_space<vmem>>) attributes {dimension_semantics = [#tpu.dimension_semantics<parallel>], iteration_bounds = array<i64: 2>, scalar_prefetch = 0 : i64, scratch_operands = 0 : i64, tpu.core_type = #tpu.core_type<tc>, window_params = [{transform_indices = @transform_0, window_bounds = array<i64: 1, 4, 256>}, {pipeline_mode = #tpu.pipeline_mode<synchronous>, transform_indices = @transform_1, window_bounds = array<i64: 4, 4>}, {pipeline_mode = #tpu.pipeline_mode<synchronous>, transform_indices = @transform_2, window_bounds = array<i64: 4, 4>}, {transform_indices = @transform_3, window_bounds = array<i64: 1, 4, 256>}]} {
    %c0 = arith.constant 0 : index
    %c0_0 = arith.constant 0 : index
    %c0_1 = arith.constant 0 : index
    %0 = vector.load %arg1[%c0, %c0_0, %c0_1] : memref<1x4x256xf32, #tpu.memory_space<vmem>>, vector<1x4x256xf32>
    %1 = vector.shape_cast %0 : vector<1x4x256xf32> to vector<4x256xf32>
    %cst = arith.constant dense<0.000000e+00> : vector<4xf32>
    %2 = vector.multi_reduction <add>, %1, %cst [1] : vector<4x256xf32> to vector<4xf32>
    %3 = vector.shape_cast %2 : vector<4xf32> to vector<4x1xf32>
    %cst_2 = arith.constant 3.906250e-03 : f32
    %4 = vector.broadcast %cst_2 : f32 to vector<4x1xf32>
    %5 = arith.mulf %3, %4 : vector<4x1xf32>
    %c0_3 = arith.constant 0 : index
    %c0_4 = arith.constant 0 : index
    %6 = vector.load %arg2[%c0_3, %c0_4] : memref<4x4xf32, #tpu.memory_space<vmem>>, vector<4x4xf32>
    %cst_5 = arith.constant dense<0.000000e+00> : vector<4x1xf32>
    %7 = tpu.matmul %6, %5, %cst_5 {dimension_numbers = #tpu.dot_dimension_numbers<[1], [0], [0], [1], [0, 0, 1, 1], [], []>} : vector<4x4xf32>, vector<4x1xf32>, vector<4x1xf32> -> vector<4x1xf32>
    %cst_6 = arith.constant 0.000000e+00 : f32
    %8 = vector.broadcast %cst_6 : f32 to vector<4x1xf32>
    %9 = arith.maximumf %7, %8 : vector<4x1xf32>
    %c0_7 = arith.constant 0 : index
    %c0_8 = arith.constant 0 : index
    %10 = vector.load %arg3[%c0_7, %c0_8] : memref<4x4xf32, #tpu.memory_space<vmem>>, vector<4x4xf32>
    %cst_9 = arith.constant dense<0.000000e+00> : vector<4x1xf32>
    %11 = tpu.matmul %10, %9, %cst_9 {dimension_numbers = #tpu.dot_dimension_numbers<[1], [0], [0], [1], [0, 0, 1, 1], [], []>} : vector<4x4xf32>, vector<4x1xf32>, vector<4x1xf32> -> vector<4x1xf32>
    %12 = arith.negf %11 : vector<4x1xf32>
    %13 = math.exp %12 : vector<4x1xf32>
    %cst_10 = arith.constant 1.000000e+00 : f32
    %14 = vector.broadcast %cst_10 : f32 to vector<4x1xf32>
    %15 = arith.addf %14, %13 : vector<4x1xf32>
    %16 = arith.divf %14, %15 : vector<4x1xf32>
    %17 = vector.broadcast %16 : vector<4x1xf32> to vector<4x256xf32>
    %18 = arith.mulf %1, %17 : vector<4x256xf32>
    %c0_11 = arith.constant 0 : index
    %c0_12 = arith.constant 0 : index
    %c0_13 = arith.constant 0 : index
    %19 = vector.load %arg4[%c0_11, %c0_12, %c0_13] : memref<1x4x256xf32, #tpu.memory_space<vmem>>, vector<1x4x256xf32>
    %20 = vector.shape_cast %19 : vector<1x4x256xf32> to vector<4x256xf32>
    %21 = vector.shape_cast %18 : vector<4x256xf32> to vector<1x4x256xf32>
    tpu.vector_store %arg4[%c0_11, %c0_12, %c0_13], %21 {strides = array<i32>} : memref<1x4x256xf32, #tpu.memory_space<vmem>>, vector<1x4x256xf32>,
    return
  }
  func.func @transform_0(%arg0: i32) -> (i32, i32, i32) {
    %c0_i32 = arith.constant 0 : i32
    %c0_i32_0 = arith.constant 0 : i32
    %c0_i32_1 = arith.constant 0 : i32
    return %arg0, %c0_i32, %c0_i32_0 : i32, i32, i32
  }
  func.func @transform_1(%arg0: i32) -> (i32, i32) {
    %c0_i32 = arith.constant 0 : i32
    %c0_i32_0 = arith.constant 0 : i32
    %c0_i32_1 = arith.constant 0 : i32
    return %c0_i32, %c0_i32_0 : i32, i32
  }
  func.func @transform_2(%arg0: i32) -> (i32, i32) {
    %c0_i32 = arith.constant 0 : i32
    %c0_i32_0 = arith.constant 0 : i32
    %c0_i32_1 = arith.constant 0 : i32
    return %c0_i32, %c0_i32_0 : i32, i32
  }
  func.func @transform_3(%arg0: i32) -> (i32, i32, i32) {
    %c0_i32 = arith.constant 0 : i32
    %c0_i32_0 = arith.constant 0 : i32
    %c0_i32_1 = arith.constant 0 : i32
    return %arg0, %c0_i32, %c0_i32_0 : i32, i32, i32
  }
}

</mosaic_0001>

<bundles_post_ra>
// kernel: ca_layer.1
= control target key start
LH: loop header
LB: loop body
LE: loop exit
PB: predicated region body
PF: predicated region fallthrough
CT: control target
= control target key end

     0   :  { %s495_s12 = smov 0   ;;  %s529_s0 = inlined_call_operand.vmem [shape: f32[2,4,256], index: 0, kind: input, shape index: {}]   ;;  %s530_s1 = inlined_call_operand.vmem [shape: f32[4,4], index: 1, kind: input, shape index: {}]   ;;  %s531_s2 = inlined_call_operand.vmem [shape: f32[4,4], index: 2, kind: input, shape index: {}]   ;;  %s532_s3 = inlined_call_operand.vmem [shape: f32[2,4,256], index: 3, kind: output, shape index: {}]  }
   0x1 LB: > { %s413_s13 = sadd.s32 4294967295, %s469_s12   ;;  %p417_p0 = scmp.ge.s32.totalorder %s469_s12, 1  ;;  %s469_s12 = sphi %s495_s12, %s13_s12  }
   0x2   : > { %p137_p1 = scmp.lt.s32.totalorder %s469_s12, 3 }
   0x4   : > { %p138_p2 = pnand %p417_p0, %p137_p1 }
   0x5   : > { %p161_p3 = scmp.lt.s32.totalorder (!%p138_p2), %s413_s13, 1  ;;  %vm175_vm0 = vcmask (!%p138_p2), 1043456   ;;  %v471_v5 = vmov (!%p138_p2), 0.0   ;;  %vm472_vm1 = vmmov (!%p138_p2), 0   ;;  %v182_v8 = vld [vmem:[%s530_s1] sm:$0xf] (!%p138_p2)  ;;  %v351_v22 = vlaneseq (!%p138_p2) }
   0x6   : > { %141 = sbr.rel (%p138_p2) target bundleno = 753 (0x2f1), region = 32  ;;  %435 = vmatprep.subr.mxu0 (!%p138_p2), %v471_v5  ;;  %440 = vmatprep.subr.mxu1 (!%p138_p2), %v471_v5  ;;  %vm183_vm2 = vcmask (!%p138_p2), 31744   ;;  %v261_v12 = vld [vmem:[%s531_s2] sm:$0xf] (!%p138_p2)  ;;  %v473_v13 = vmov (!%p138_p2), 0  }
   0x7   : > { %437 = vmatprep.mubr.msk.f32.mxu0 (!%p138_p2), %vm472_vm1, %v471_v5  ;;  %442 = vmatprep.mubr.msk.f32.mxu1 (!%p138_p2), %vm472_vm1, %v471_v5  ;;  %v474_v20 = vmov (!%p138_p2), 839922192   ;;  %v352_v24 = vshrl.u32 (!%p138_p2), %v351_v22, 7 }
   0x8   : > { %457 = vset.pattern.permute.xlu0 (!%p138_p2), %v473_v13  ;;  %v349_v21 = vunpack.c.l.s4 (!%p138_p2), %v474_v20 }
   0xa   : > { %v350_v23 = vunpack.c.0.s8 (!%p138_p2), %v349_v21 }
   0xc   : > { %v353_v25 = vsub.s32 (!%p138_p2), %v350_v23, %v352_v24 }
   0xd   : > { %s534_s13 = smov (!%p161_p3, %s413_s13), 1 }
   0xe   : > { %s429_s14 = sshll.u32 %s534_s13, 3 }
   0xf   : > { %s165_s17 = scalar_lea.vmem %s529_s0, %s429_s14  ;;  %s170_s24 = scalar_lea.vmem %s532_s3, %s429_s14 }
  0x10   : > { %v171_v0 = vld [vmem:[%s165_s17] sm:$0xff] }
  0x11   : > { %v173_v1 = vcombine.high %v171_v0, %v171_v0  ;;  %v176_v2 = vsel %vm175_vm0, %v171_v0, 0.0 }
  0x13   : > { %v177_v3 = vsel %vm175_vm0, %v173_v1, 0.0 }
  0x14   : > { %v178_v4 = vadd.f32 %v177_v3, %v176_v2 }
  0x16   : > { %179 = vadd.xlane.f32.xlu0 %v178_v4 }
  0xa3   : > { %v180_v6 = vpop.xlane.xlu0 %179 }
  0xa4   : > { %v181_v7 = vmul.f32 0.00390625, %v180_v6 }
  0xa6   : > { %436 = vmatpush3.msk.msra.mxu0 %vm175_vm0, %v181_v7 }
  0xa7   : > { %438 = vmatmul.mubr.msk.f32.vlgmr.msra.gmra.mrb[0].mxu0 %vm183_vm2, %v182_v8 }
 0x17a   : > { %v256_v9 = vpop.f32.mrb[0].mxu0 }
 0x17b   : > { %v260_v10 = vmax.f32 %v256_v9, 0.0  ;;  %v439_v11 = vpop.f32.mrb[1].mxu0 }
 0x17d   : > { %441 = vmatpush3.msk.msra.mxu1 %vm175_vm0, %v260_v10 }
 0x17e   : > { %443 = vmatmul.mubr.msk.f32.vlgmr.msra.gmra.mrb[0].mxu1 %vm183_vm2, %v261_v12 }
 0x251   : > { %v334_v14 = vpop.f32.mrb[0].mxu1 }
 0x252   : > { %v426_v15 = vmul.f32 -1.442695, %v334_v14  ;;  %v444_v16 = vpop.f32.mrb[1].mxu1 }
 0x254   : > { %459 = vpow2.f32 %v426_v15 }
 0x25e   : > { %v460_v17 = vpop.eup %459 }
 0x25f   : > { %v341_v18 = vadd.f32 1.0, %v460_v17 }
 0x261   : > { %461 = vrcp.f32 %v341_v18 }
 0x26b   : > { %v462_v19 = vpop.eup %461 }
 0x26c   : > { %346 = vperm.xlu0 %457, %v462_v19  }
 0x2eb   : > { %v347_v26 = vpop.permute.xlu0 %346 }
 0x2ec   : > { %v354_v27 = vrot.slane %v347_v26, %v353_v25 }
 0x2ee   : > { %v356_v28 = vmul.f32 %v354_v27, %v171_v0 }
 0x2f0   : > { %357 = vst [vmem:[%s170_s24] sm:$0xff] %v356_v28 }
 0x2f1 PF: > { %s13_s12 = sadd.s32 1, %s469_s12  }
 0x2f2   : > { %p10_p4 = scmp.ge.s32.totalorder %s13_s12, 4  }
 0x2f4   :  { %12 = sbr.rel (!%p10_p4) target bundleno = 1 (0x1), region = 62 }

</bundles_post_ra>
